<compile_context>
chip_gen: v7x
topology: tpu7x:2x2x1
jax: 0.10.0
libtpu: 0.0.40
codegen_flags: <defaults>
</compile_context>

<pallas_src>
import jax
import jax.numpy as jnp
from jax.experimental import pallas as pl
from jax.experimental.pallas import tpu as pltpu

IN_F = 10
HID_F = 10
OUT_F = 5

# Max batch-tile width in lanes (multiple of 128). Feature-major layout costs ~200 B of
# VMEM per lane (double-buffered x + out, plus the hidden temp), so 64K lanes ~= 16 MiB:
# safely inside the scoped limit on v5e/v6e and well under v7x's 64 MiB physical VMEM.
MAX_TB = 64 * 1024
VMEM_LIMIT_BYTES = 48 * 1024 * 1024


def _round_up(n: int, m: int) -> int:
    return ((n + m - 1) // m) * m


def mlp_kernel(xt_ref, w1t_ref, b1_ref, w2t_ref, b2_ref, o_ref):
    # xt_ref : (IN_F, TB)    batch tile, batch in lanes (lane-dense)
    # w1t_ref: (HID_F, IN_F) VMEM-resident across all grid steps
    # b1_ref : (HID_F, 1)    broadcasts along lanes
    # w2t_ref: (OUT_F, HID_F)
    # b2_ref : (OUT_F, 1)
    # o_ref  : (OUT_F, TB)   lane-dense output -> unmasked full-lane stores
    h = jnp.dot(w1t_ref[...], xt_ref[...], preferred_element_type=jnp.float32)
    h = jnp.maximum(h + b1_ref[...], 0.0)                       # ReLU
    y = jnp.dot(w2t_ref[...], h, preferred_element_type=jnp.float32)
    o_ref[...] = (y + b2_ref[...]).astype(o_ref.dtype)


def toy_model_forward(x, w1, b1, w2, b2, *, max_tb: int = MAX_TB):
    """x: (B, 10) f32; w1: (10, 10) (in,out); b1: (1, 10); w2: (10, 5); b2: (1, 5).

    Returns (B, 5) f32, equal to relu(x @ w1 + b1) @ w2 + b2.
    """
    B = x.shape[0]

    # Pad batch only up to a multiple of 128 (lane width); no tile-sized padding.
    b128 = _round_up(max(B, 1), 128)

    # Batch tile: multiple of 128, capped by MAX_TB, and split into >= 4 grid steps for
    # large batches so the pipeline has work to overlap and both v7x TCs are fed.
    tb = min(max_tb, b128)
    if b128 >= 4 * 128:
        tb = min(tb, _round_up(pl.cdiv(b128, 4), 128))
    tb = max(tb, 128)
    grid = (pl.cdiv(b128, tb),)   # last block may be partial; Pallas masks its stores

    # Feature-major / lane-dense layout: single cheap pad + transpose (no zero-filled
    # tile-wide buffer). Padding rows compute garbage in their own lanes only.
    x_pad = jnp.pad(x.astype(jnp.float32), ((0, b128 - B), (0, 0)))   # (b128, IN_F)
    x_t = x_pad.T                                                     # (IN_F, b128)
    w1t = w1.T.astype(jnp.float32)   # (HID_F, IN_F)
    w2t = w2.T.astype(jnp.float32)   # (OUT_F, HID_F)
    b1c = b1.reshape(HID_F, 1).astype(jnp.float32)
    b2c = b2.reshape(OUT_F, 1).astype(jnp.float32)

    flops = 2 * b128 * (IN_F * HID_F + HID_F * OUT_F)
    bytes_accessed = 4 * (
        b128 * IN_F + b128 * OUT_F          # activations in / out
        + IN_F * HID_F + HID_F * OUT_F      # weights
        + HID_F + OUT_F                     # biases
    )

    out_t = pl.pallas_call(
        mlp_kernel,
        out_shape=jax.ShapeDtypeStruct((OUT_F, b128), jnp.float32),
        grid=grid,
        in_specs=[
            pl.BlockSpec((IN_F, tb), lambda i: (0, i)),        # x tile: batch-tiled
            pl.BlockSpec((HID_F, IN_F), lambda i: (0, 0)),     # W1^T: VMEM-resident
            pl.BlockSpec((HID_F, 1), lambda i: (0, 0)),        # b1
            pl.BlockSpec((OUT_F, HID_F), lambda i: (0, 0)),    # W2^T
            pl.BlockSpec((OUT_F, 1), lambda i: (0, 0)),        # b2
        ],
        out_specs=pl.BlockSpec((OUT_F, tb), lambda i: (0, i)), # lane-dense output tile
        compiler_params=pltpu.CompilerParams(
            dimension_semantics=("parallel",),                  # shard batch across TCs
            vmem_limit_bytes=VMEM_LIMIT_BYTES,
        ),
        cost_estimate=pl.CostEstimate(
            flops=flops, transcendentals=0, bytes_accessed=bytes_accessed
        ),
    )(x_t, w1t, b1c, w2t, b2c)

    # Back to PyTorch layout (B, OUT_F), dropping batch padding. (Consumers that can take
    # the lane-dense (OUT_F, B) layout directly could skip this final transpose.)
    return out_t[:, :B].T


def init_params(key):
    """Deterministic init mimicking nn.Linear's uniform(-1/sqrt(fan_in), 1/sqrt(fan_in))."""
    k1, k2, k3, k4 = jax.random.split(key, 4)
    lim1 = 1.0 / jnp.sqrt(jnp.float32(IN_F))
    lim2 = 1.0 / jnp.sqrt(jnp.float32(HID_F))
    # Stored as (in, out) — already "transposed" relative to PyTorch's (out, in).
    w1 = jax.random.uniform(k1, (IN_F, HID_F), jnp.float32, -lim1, lim1)
    b1 = jax.random.uniform(k2, (1, HID_F), jnp.float32, -lim1, lim1)
    w2 = jax.random.uniform(k3, (HID_F, OUT_F), jnp.float32, -lim2, lim2)
    b2 = jax.random.uniform(k4, (1, OUT_F), jnp.float32, -lim2, lim2)
    return w1, b1, w2, b2


if __name__ == "__main__":
    key = jax.random.PRNGKey(0)
    k_x, k_p = jax.random.split(key)
    w1, b1, w2, b2 = init_params(k_p)

    # B=8: single full block. B=520: multi-step grid with a partial (masked) last block.
    for B in (8, 520):
        x = jax.random.normal(jax.random.fold_in(k_x, B), (B, IN_F), jnp.float32)
        out = toy_model_forward(x, w1, b1, w2, b2)
        out = jax.block_until_ready(out)

        # Pure-JAX reference check of the same math.
        ref = jnp.maximum(x @ w1 + b1, 0.0) @ w2 + b2
        assert out.shape == (B, OUT_F)
        assert jnp.allclose(out, ref, atol=1e-5, rtol=1e-5)

    print("KERNEL_OK")
</pallas_src>

<mosaic_0001>
module attributes {stable_mosaic.version = 11 : i64} {
  func.func @mlp_kernel(%arg0: i32, %arg1: memref<10x128xf32, #tpu.memory_space<vmem>>, %arg2: memref<10x10xf32, #tpu.memory_space<vmem>>, %arg3: memref<10x1xf32, #tpu.memory_space<vmem>>, %arg4: memref<5x10xf32, #tpu.memory_space<vmem>>, %arg5: memref<5x1xf32, #tpu.memory_space<vmem>>, %arg6: memref<5x128xf32, #tpu.memory_space<vmem>>) attributes {dimension_semantics = [#tpu.dimension_semantics<parallel>], iteration_bounds = array<i64: 1>, scalar_prefetch = 0 : i64, scratch_operands = 0 : i64, tpu.core_type = #tpu.core_type<tc>, window_params = [{transform_indices = @transform_0, window_bounds = array<i64: 10, 128>}, {pipeline_mode = #tpu.pipeline_mode<synchronous>, transform_indices = @transform_1, window_bounds = array<i64: 10, 10>}, {pipeline_mode = #tpu.pipeline_mode<synchronous>, transform_indices = @transform_2, window_bounds = array<i64: 10, 1>}, {pipeline_mode = #tpu.pipeline_mode<synchronous>, transform_indices = @transform_3, window_bounds = array<i64: 5, 10>}, {pipeline_mode = #tpu.pipeline_mode<synchronous>, transform_indices = @transform_4, window_bounds = array<i64: 5, 1>}, {transform_indices = @transform_5, window_bounds = array<i64: 5, 128>}]} {
    %c0 = arith.constant 0 : index
    %c0_0 = arith.constant 0 : index
    %0 = vector.load %arg2[%c0, %c0_0] : memref<10x10xf32, #tpu.memory_space<vmem>>, vector<10x10xf32>
    %c0_1 = arith.constant 0 : index
    %c0_2 = arith.constant 0 : index
    %1 = vector.load %arg1[%c0_1, %c0_2] : memref<10x128xf32, #tpu.memory_space<vmem>>, vector<10x128xf32>
    %cst = arith.constant dense<0.000000e+00> : vector<10x128xf32>
    %2 = tpu.matmul %0, %1, %cst {dimension_numbers = #tpu.dot_dimension_numbers<[1], [0], [0], [1], [0, 0, 1, 1], [], []>} : vector<10x10xf32>, vector<10x128xf32>, vector<10x128xf32> -> vector<10x128xf32>
    %c0_3 = arith.constant 0 : index
    %c0_4 = arith.constant 0 : index
    %3 = vector.load %arg3[%c0_3, %c0_4] : memref<10x1xf32, #tpu.memory_space<vmem>>, vector<10x1xf32>
    %4 = vector.broadcast %3 : vector<10x1xf32> to vector<10x128xf32>
    %5 = arith.addf %2, %4 : vector<10x128xf32>
    %cst_5 = arith.constant 0.000000e+00 : f32
    %6 = vector.broadcast %cst_5 : f32 to vector<10x128xf32>
    %7 = arith.maximumf %5, %6 : vector<10x128xf32>
    %c0_6 = arith.constant 0 : index
    %c0_7 = arith.constant 0 : index
    %8 = vector.load %arg4[%c0_6, %c0_7] : memref<5x10xf32, #tpu.memory_space<vmem>>, vector<5x10xf32>
    %cst_8 = arith.constant dense<0.000000e+00> : vector<5x128xf32>
    %9 = tpu.matmul %8, %7, %cst_8 {dimension_numbers = #tpu.dot_dimension_numbers<[1], [0], [0], [1], [0, 0, 1, 1], [], []>} : vector<5x10xf32>, vector<10x128xf32>, vector<5x128xf32> -> vector<5x128xf32>
    %c0_9 = arith.constant 0 : index
    %c0_10 = arith.constant 0 : index
    %10 = vector.load %arg5[%c0_9, %c0_10] : memref<5x1xf32, #tpu.memory_space<vmem>>, vector<5x1xf32>
    %11 = vector.broadcast %10 : vector<5x1xf32> to vector<5x128xf32>
    %12 = arith.addf %9, %11 : vector<5x128xf32>
    %c0_11 = arith.constant 0 : index
    %c0_12 = arith.constant 0 : index
    %13 = vector.load %arg6[%c0_11, %c0_12] : memref<5x128xf32, #tpu.memory_space<vmem>>, vector<5x128xf32>
    tpu.vector_store %arg6[%c0_11, %c0_12], %12 {strides = array<i32>} : memref<5x128xf32, #tpu.memory_space<vmem>>, vector<5x128xf32>,
    return
  }
  func.func @transform_0(%arg0: i32) -> (i32, i32) {
    %c0_i32 = arith.constant 0 : i32
    %c0_i32_0 = arith.constant 0 : i32
    return %c0_i32, %arg0 : i32, i32
  }
  func.func @transform_1(%arg0: i32) -> (i32, i32) {
    %c0_i32 = arith.constant 0 : i32
    %c0_i32_0 = arith.constant 0 : i32
    %c0_i32_1 = arith.constant 0 : i32
    return %c0_i32, %c0_i32_0 : i32, i32
  }
  func.func @transform_2(%arg0: i32) -> (i32, i32) {
    %c0_i32 = arith.constant 0 : i32
    %c0_i32_0 = arith.constant 0 : i32
    %c0_i32_1 = arith.constant 0 : i32
    return %c0_i32, %c0_i32_0 : i32, i32
  }
  func.func @transform_3(%arg0: i32) -> (i32, i32) {
    %c0_i32 = arith.constant 0 : i32
    %c0_i32_0 = arith.constant 0 : i32
    %c0_i32_1 = arith.constant 0 : i32
    return %c0_i32, %c0_i32_0 : i32, i32
  }
  func.func @transform_4(%arg0: i32) -> (i32, i32) {
    %c0_i32 = arith.constant 0 : i32
    %c0_i32_0 = arith.constant 0 : i32
    %c0_i32_1 = arith.constant 0 : i32
    return %c0_i32, %c0_i32_0 : i32, i32
  }
  func.func @transform_5(%arg0: i32) -> (i32, i32) {
    %c0_i32 = arith.constant 0 : i32
    %c0_i32_0 = arith.constant 0 : i32
    return %c0_i32, %arg0 : i32, i32
  }
}

</mosaic_0001>

<bundles_post_ra>
// kernel: tpu_custom_call.1
= control target key start
LH: loop header
LB: loop body
LE: loop exit
PB: predicated region body
PF: predicated region fallthrough
CT: control target
= control target key end

     0   :  { %10 = vsyncpa [#allocation3], 0  ;;  %s427_s0 = inlined_call_operand.vmem [shape: f32[10,128], index: 0, kind: input, shape index: {}]   ;;  %s428_s1 = inlined_call_operand.hbm [shape: f32[10,10], index: 1, kind: input, shape index: {}]   ;;  %s429_s2 = inlined_call_operand.vmem [shape: f32[10,1], index: 2, kind: input, shape index: {}]   ;;  %s430_s3 = inlined_call_operand.vmem [shape: f32[5,10], index: 3, kind: input, shape index: {}]   ;;  %s431_s4 = inlined_call_operand.vmem [shape: f32[5,1], index: 4, kind: input, shape index: {}]   ;;  %s432_s5 = inlined_call_operand.hbm [shape: f32[5,128], index: 5, kind: output, shape index: {}]  }
   0x1   :  { %11 = vsyncpa [#allocation4], 0  ;;  %s333_s18 = smov [#allocation2]   ;;  %s285_s22 = scalar_lea.hbm %s428_s1, 256 }
   0x2   :  { %s19_s19 = sshll.u32 %s333_s18, 4  ;;  %p286_p0 = scmp.ne.s32.totalorder %s428_s1, %s285_s22  ;;  %s20_s19 = int_to_ptr.vmem [resolvable:$true] %s19_s19 }
   0x3   :  { %p289_p1 = scmp.lt.u32.totalorder %s285_s22, %s428_s1 }
   0x5   :  { %p291_p2 = pnand %p289_p1, %p286_p0 }
   0x7   :  { %294 = shalt.err (!%p291_p2)
}
   0x8   :  { %s295_s27 = scalar_lea.vmem %s20_s19, 256  ;;  %p300_p4 = scmp.lt.s32.totalorder %s20_s19, %s20_s19 }
   0x9   :  { %p296_p3 = scmp.ne.s32.totalorder %s20_s19, %s295_s27  ;;  %p301_p5 = scmp.lt.s32.totalorder %s295_s27, %s295_s27 }
   0xb   :  { %p302_p6 = por %p301_p5, %p300_p4 }
   0xd   :  { %p303_p7 = pnand %p302_p6, %p296_p3 }
   0xf   :  { %306 = shalt.err (!%p303_p7)
}
  0x10   :  { %s334_s28 = smov 128   ;;  %s335_s29 = smov 8  }
  0x11   :  { %25 = dma.hbm_to_vmem [thread:$0]  %s428_s1, 256, %s20_s19, [#allocation3], %s334_s28, %s334_s28, %s335_s29  }
  0x12   :  { %329 = dma.done.wait [#allocation3], 256  }
  0x13   :  { %330 = vsyncadd [#allocation3], 4294967040  ;;  %v336_v0 = vmov 0   ;;  %vm58_vm0 = vcmask 1041408   ;;  %vm51_vm1 = vcmask 80896   ;;  %vm337_vm2 = vmmov 1  }
  0x14   :  { %283 = vset.pattern.permute.xlu0 %v336_v0  ;;  %284 = vset.pattern.permute.xlu1 %v336_v0  ;;  %vm384_vm3 = vmpackc.low %vm58_vm0, %vm337_vm2  ;;  %v37_v2 = vld [vmem:[%s427_s0] sm:$0xff]  ;;  %v38_v3 = vld [vmem:[%s427_s0 + $0x8] sm:$0x3]  ;;  %v338_v9 = vmov 0.0|0.0   ;;  %vm339_vm4 = vmmov 0   ;;  %v340_v10 = vmov 0.0  }
  0x15   :  { %v35_v4 = vld [vmem:[#allocation2] sm:$0xff]  ;;  %v264_v5 = vpack.c.bf16 %v38_v3, %v37_v2  ;;  %v40_v7 = vld [vmem:[%s429_s2 + $0x8] sm:$0x3]  ;;  %270 = vmatprep.subr.bf16.mxu1 %v338_v9  ;;  %261 = vmatprep.mubr.msk.f32.mxu1 %vm339_vm4, %v340_v10 }
  0x16   :  { %254 = vmatprep.mubr.msk.f32.mxu0 %vm51_vm1, %v35_v4  ;;  %v39_v6 = vld [vmem:[%s429_s2] sm:$0xff]  ;;  %v36_v8 = vld [vmem:[#allocation2 + $0x8] sm:$0x3] }
  0x17   :  { %43 = vperm.xlu0 %283, %v39_v6   ;;  %266 = vmatprep.subr.msk.bf16.mxu0 %vm384_vm3, %v264_v5  ;;  %v140_v11 = vld [vmem:[%s431_s4] sm:$0x1f]  ;;  %s341_s4 = smov [#allocation5]  }
  0x18   :  { %269 = vmatpush3.bf16.msk.msra.mxu0 %vm384_vm3, %v264_v5  ;;  %143 = vperm.xlu1 %284, %v140_v11   ;;  %v139_v21 = vld [vmem:[%s430_s3] sm:$0x1f]  ;;  %s229_s16 = sshll.u32 %s341_s4, 4  ;;  %s230_s16 = int_to_ptr.vmem [resolvable:$true] %s229_s16 }
  0x19   :  { %s307_s17 = scalar_lea.vmem %s230_s16, 128  ;;  %p312_p9 = scmp.lt.s32.totalorder %s230_s16, %s230_s16 }
  0x1a   :  { %p308_p8 = scmp.ne.s32.totalorder %s230_s16, %s307_s17  ;;  %p313_p10 = scmp.lt.s32.totalorder %s307_s17, %s307_s17 }
  0x1b   :  { %48 = vperm.xlu0 %283, %v40_v7   ;;  %255 = vmatmul.mubr.msk.f32.vlgmr.msra.gmra.mrb[0].mxu0 %vm51_vm1, %v36_v8 }
  0x1c   :  { %p314_p11 = por %p313_p10, %p312_p9 }
  0x1e   :  { %p315_p12 = pnand %p314_p11, %p308_p8 }
  0x96   :  { %v44_v12 = vpop.permute.xlu0 %43 }
  0x97   :  { %v144_v22 = vpop.permute.xlu1 %143 }
  0x9a   :  { %v49_v13 = vpop.permute.xlu0 %48 }
  0xee   :  { %v256_v14 = vpop.f32.mrb[0].mxu0 }
  0xef   :  { %v134_v15 = vadd.f32 %v256_v14, %v49_v13  ;;  %v128_v16 = vpop.f32.mrb[1].mxu0 }
  0xf0   :  { %v129_v17 = vadd.f32 %v128_v16, %v44_v12 }
  0xf1   :  { %v138_v18 = vmax.f32 %v134_v15, 0.0 }
  0xf2   :  { %v137_v19 = vmax.f32 %v129_v17, 0.0 }
  0xf4   :  { %v271_v20 = vpack.c.bf16 %v138_v18, %v137_v19 }
  0xf6   :  { %273 = vmatpush3.bf16.msk.msra.mxu1 %vm384_vm3, %v271_v20 }
  0xf9   :  { %262 = vmatmul.mubr.msk.f32.vlgmr.msra.gmra.mrb[0].mxu1 %vm51_vm1, %v139_v21 }
 0x1cc   :  { %v218_v23 = vpop.f32.mrb[0].mxu1 }
 0x1cd   :  { %v219_v24 = vadd.f32 %v218_v23, %v144_v22  ;;  %v263_v25 = vpop.f32.mrb[1].mxu1 }
 0x1cf   :  { %222 = vst [vmem:[#allocation5] sm:$0x1f] %v219_v24 }
 0x1d0   :  { %318 = shalt.err (!%p315_p12)
}
 0x1d1   :  { %s319_s3 = scalar_lea.hbm %s432_s5, 128 }
 0x1d2   :  { %p320_p13 = scmp.ne.s32.totalorder %s432_s5, %s319_s3  ;;  %p323_p0 = scmp.lt.u32.totalorder %s319_s3, %s432_s5 }
 0x1d4   :  { %p325_p1 = pnand %p323_p0, %p320_p13 }
 0x1d6   :  { %328 = shalt.err (!%p325_p1)
}
 0x1d7   :  { %232 = dma.vmem_to_hbm [thread:$0]  %s230_s16, 128, %s432_s5, [#allocation4]  }
 0x1d8   :  { %331 = dma.done.wait [#allocation4], 128  }
 0x1d9   :  { %332 = vsyncadd [#allocation4], 4294967168 }
 0x1da   :  { %236 = vsyncpa [#allocation3], 1 }
 0x1db   :  { %237 = vsyncpa [#allocation4], 1 }

</bundles_post_ra>
